<compile_context>
chip_gen: v7x
topology: tpu7x:2x2x1
jax: 0.10.0
libtpu: 0.0.40
codegen_flags: <defaults>
</compile_context>

<pallas_src>
import functools

import jax
import jax.numpy as jnp
from jax.experimental import pallas as pl
from jax.experimental.pallas import tpu as pltpu

INPUT_DIM = 32
HIDDEN = 32                       # == config['rnn_units'] (head input dim)
N_ACTION = 8                      # discrete 'action' head width
N_MOVE = 4                        # continuous 'move' head width
OUT_PACK = N_ACTION + N_MOVE      # meaningful fused head width (12)
OUT_PAD = 128                     # lane-dense packed output width (zero-padded head)
STD_X_COEF = 1.0
STD_Y_COEF = 0.5
MAX_TILE_B = 1024                 # rows per grid step for large batches
BATCH = 256                       # example rollout-style batch -> single tile


def policy_kernel(x_ref, w1_ref, b1_ref, w2_ref, b2_ref, wh_ref, bh_ref, out_ref):
    """Fused MLP trunk + fused (action|move|zero-pad) head for one batch tile.

    Weight/bias refs arrive via constant-index BlockSpecs, so they are DMA'd once
    and stay VMEM-resident across the batch grid; only x / out blocks stream.
    """
    x = x_ref[...]                                     # bf16 (tile_b, 32)

    # MLP layer 1: Linear (bf16 operands, f32 accumulation) -> ReLU
    h = jnp.dot(x, w1_ref[...], preferred_element_type=jnp.float32) + b1_ref[...]
    h = jnp.maximum(h, 0.0)

    # MLP layer 2: Linear -> ReLU
    h = jnp.dot(h.astype(jnp.bfloat16), w2_ref[...],
                preferred_element_type=jnp.float32) + b2_ref[...]
    h = jnp.maximum(h, 0.0)

    # Fused heads (lane-dense): one matmul produces
    #   [ logits(8) | move_pre_tanh(4) | zeros(116) ]  -> 128 output lanes.
    # TODO(synk): action-mask fill (-1e10 where mask==0) not emitted since
    # use_action_mask={'action': False} in this config.
    y = jnp.dot(h.astype(jnp.bfloat16), wh_ref[...],
                preferred_element_type=jnp.float32) + bh_ref[...]

    # tanh only on columns >= N_ACTION (move + zero padding; tanh(0)=0 so the
    # padding lanes stay exactly zero). Logits untouched.
    col = jax.lax.broadcasted_iota(jnp.int32, y.shape, 1)
    out_ref[...] = jnp.where(col < N_ACTION, y, jnp.tanh(y))


@jax.jit
def _policy_forward_impl(params, x):
    B = x.shape[0]
    tile_b = B if B <= MAX_TILE_B else MAX_TILE_B
    grid = pl.cdiv(B, tile_b)

    # bf16 streaming input: halves x bytes over HBM; cast fuses into this jit.
    x_bf16 = x.astype(jnp.bfloat16)

    def resident(arr):
        # Whole-array block with a constant index_map -> loaded once, VMEM-resident.
        zero_idx = (0,) * arr.ndim
        return pl.BlockSpec(arr.shape, lambda i, z=zero_idx: z)

    packed = pl.pallas_call(
        policy_kernel,
        grid=(grid,),
        in_specs=[
            pl.BlockSpec((tile_b, INPUT_DIM), lambda i: (i, 0)),   # x tiles stream
            resident(params["w1"]), resident(params["b1"]),
            resident(params["w2"]), resident(params["b2"]),
            resident(params["wh"]), resident(params["bh"]),
        ],
        out_specs=pl.BlockSpec((tile_b, OUT_PAD), lambda i: (i, 0)),
        out_shape=jax.ShapeDtypeStruct((B, OUT_PAD), jnp.float32),
        compiler_params=pltpu.CompilerParams(
            dimension_semantics=("parallel",)),   # shards batch tiles across v7x's 2 TCs when grid > 1
    )(x_bf16, params["w1"], params["b1"], params["w2"], params["b2"],
      params["wh"], params["bh"])

    # Slices fuse with the surrounding jit (no standalone HBM round trips).
    logits = packed[:, :N_ACTION]
    mean = packed[:, N_ACTION:OUT_PACK]

    # scale = sigmoid(logstd / std_x_coef) * std_y_coef : parameter-only glue
    # (no dependence on x), so it stays in plain JAX.
    scale = jax.nn.sigmoid(params["logstd"] / STD_X_COEF) * STD_Y_COEF

    return {"action": logits, "move": (mean, scale)}


def policy_forward(params, x, action_mask=None):
    """Returns (outs, state) exactly like Policy.forward:
       outs = {'action': logits (B,8), 'move': (mean (B,4), scale (4,))}, state=None."""
    # Guard: this kernel build assumes use_action_mask={'action': False}.
    assert action_mask is None, "action-mask path not compiled into this kernel"
    outs = _policy_forward_impl(params, x)
    state = None  # rnn_type=None -> MLP returns no state
    return outs, state


def _init_params(key):
    """Deterministic synthetic init mirroring nn.Linear's U(-1/sqrt(fan_in), +)."""
    keys = jax.random.split(key, 9)

    def linear_init(kw, kb, fan_in, fan_out):
        bound = 1.0 / jnp.sqrt(jnp.float32(fan_in))
        w = jax.random.uniform(kw, (fan_in, fan_out), jnp.float32, -bound, bound)
        b = jax.random.uniform(kb, (1, fan_out), jnp.float32, -bound, bound)
        return w, b

    w1, b1 = linear_init(keys[0], keys[1], INPUT_DIM, HIDDEN)
    w2, b2 = linear_init(keys[2], keys[3], HIDDEN, HIDDEN)
    wa, ba = linear_init(keys[4], keys[5], HIDDEN, N_ACTION)
    wm, bm = linear_init(keys[6], keys[7], HIDDEN, N_MOVE)

    # Fuse the two head linears into one lane-dense (HIDDEN, 128) matmul:
    # columns [0:8]=action, [8:12]=move, [12:128]=zero padding.
    wh = (jnp.zeros((HIDDEN, OUT_PAD), jnp.float32)
          .at[:, :N_ACTION].set(wa)
          .at[:, N_ACTION:OUT_PACK].set(wm))
    bh = (jnp.zeros((1, OUT_PAD), jnp.float32)
          .at[:, :N_ACTION].set(ba)
          .at[:, N_ACTION:OUT_PACK].set(bm))

    # sigmoid_scale=True -> logstd initialized to std_x_coef + zeros(num_outputs)
    logstd = jnp.full((N_MOVE,), STD_X_COEF, dtype=jnp.float32)

    params = dict(
        w1=w1.astype(jnp.bfloat16), b1=b1,
        w2=w2.astype(jnp.bfloat16), b2=b2,
        wh=wh.astype(jnp.bfloat16), bh=bh,
        logstd=logstd,
    )
    return params, keys[8]


if __name__ == "__main__":
    params, xkey = _init_params(jax.random.PRNGKey(0))
    x = jax.random.normal(xkey, (BATCH, INPUT_DIM), dtype=jnp.float32)

    outs, state = policy_forward(params, x)
    jax.block_until_ready(outs)

    logits = outs["action"]
    mean, scale = outs["move"]
    assert logits.shape == (BATCH, N_ACTION) and logits.dtype == jnp.float32
    assert mean.shape == (BATCH, N_MOVE) and mean.dtype == jnp.float32
    assert scale.shape == (N_MOVE,)
    assert state is None
    assert bool(jnp.all(jnp.abs(mean) <= 1.0))  # tanh output range sanity check
    assert bool(jnp.all(jnp.isfinite(logits)))

    print("KERNEL_OK")
</pallas_src>

<mosaic_0001>
module attributes {stable_mosaic.version = 11 : i64} {
  func.func @policy_kernel(%arg0: i32, %arg1: memref<256x32xbf16, #tpu.memory_space<vmem>>, %arg2: memref<32x32xbf16, #tpu.memory_space<vmem>>, %arg3: memref<1x32xf32, #tpu.memory_space<vmem>>, %arg4: memref<32x32xbf16, #tpu.memory_space<vmem>>, %arg5: memref<1x32xf32, #tpu.memory_space<vmem>>, %arg6: memref<32x128xbf16, #tpu.memory_space<vmem>>, %arg7: memref<1x128xf32, #tpu.memory_space<vmem>>, %arg8: memref<256x128xf32, #tpu.memory_space<vmem>>) attributes {dimension_semantics = [#tpu.dimension_semantics<parallel>], iteration_bounds = array<i64: 1>, scalar_prefetch = 0 : i64, scratch_operands = 0 : i64, tpu.core_type = #tpu.core_type<tc>, window_params = [{transform_indices = @transform_0, window_bounds = array<i64: 256, 32>}, {pipeline_mode = #tpu.pipeline_mode<synchronous>, transform_indices = @transform_1, window_bounds = array<i64: 32, 32>}, {pipeline_mode = #tpu.pipeline_mode<synchronous>, transform_indices = @transform_2, window_bounds = array<i64: 1, 32>}, {pipeline_mode = #tpu.pipeline_mode<synchronous>, transform_indices = @transform_3, window_bounds = array<i64: 32, 32>}, {pipeline_mode = #tpu.pipeline_mode<synchronous>, transform_indices = @transform_4, window_bounds = array<i64: 1, 32>}, {pipeline_mode = #tpu.pipeline_mode<synchronous>, transform_indices = @transform_5, window_bounds = array<i64: 32, 128>}, {pipeline_mode = #tpu.pipeline_mode<synchronous>, transform_indices = @transform_6, window_bounds = array<i64: 1, 128>}, {transform_indices = @transform_7, window_bounds = array<i64: 256, 128>}]} {
    %c0 = arith.constant 0 : index
    %c0_0 = arith.constant 0 : index
    %0 = vector.load %arg1[%c0, %c0_0] : memref<256x32xbf16, #tpu.memory_space<vmem>>, vector<256x32xbf16>
    %c0_1 = arith.constant 0 : index
    %c0_2 = arith.constant 0 : index
    %1 = vector.load %arg2[%c0_1, %c0_2] : memref<32x32xbf16, #tpu.memory_space<vmem>>, vector<32x32xbf16>
    %cst = arith.constant dense<0.000000e+00> : vector<256x32xf32>
    %2 = tpu.matmul %0, %1, %cst {dimension_numbers = #tpu.dot_dimension_numbers<[1], [0], [0], [1], [0, 0, 1, 1], [], []>} : vector<256x32xbf16>, vector<32x32xbf16>, vector<256x32xf32> -> vector<256x32xf32>
    %c0_3 = arith.constant 0 : index
    %c0_4 = arith.constant 0 : index
    %3 = vector.load %arg3[%c0_3, %c0_4] : memref<1x32xf32, #tpu.memory_space<vmem>>, vector<1x32xf32>
    %4 = vector.broadcast %3 : vector<1x32xf32> to vector<256x32xf32>
    %5 = arith.addf %2, %4 : vector<256x32xf32>
    %cst_5 = arith.constant 0.000000e+00 : f32
    %6 = vector.broadcast %cst_5 : f32 to vector<256x32xf32>
    %7 = arith.maximumf %5, %6 : vector<256x32xf32>
    %8 = arith.truncf %7 : vector<256x32xf32> to vector<256x32xbf16>
    %c0_6 = arith.constant 0 : index
    %c0_7 = arith.constant 0 : index
    %9 = vector.load %arg4[%c0_6, %c0_7] : memref<32x32xbf16, #tpu.memory_space<vmem>>, vector<32x32xbf16>
    %cst_8 = arith.constant dense<0.000000e+00> : vector<256x32xf32>
    %10 = tpu.matmul %8, %9, %cst_8 {dimension_numbers = #tpu.dot_dimension_numbers<[1], [0], [0], [1], [0, 0, 1, 1], [], []>} : vector<256x32xbf16>, vector<32x32xbf16>, vector<256x32xf32> -> vector<256x32xf32>
    %c0_9 = arith.constant 0 : index
    %c0_10 = arith.constant 0 : index
    %11 = vector.load %arg5[%c0_9, %c0_10] : memref<1x32xf32, #tpu.memory_space<vmem>>, vector<1x32xf32>
    %12 = vector.broadcast %11 : vector<1x32xf32> to vector<256x32xf32>
    %13 = arith.addf %10, %12 : vector<256x32xf32>
    %cst_11 = arith.constant 0.000000e+00 : f32
    %14 = vector.broadcast %cst_11 : f32 to vector<256x32xf32>
    %15 = arith.maximumf %13, %14 : vector<256x32xf32>
    %16 = arith.truncf %15 : vector<256x32xf32> to vector<256x32xbf16>
    %c0_12 = arith.constant 0 : index
    %c0_13 = arith.constant 0 : index
    %17 = vector.load %arg6[%c0_12, %c0_13] : memref<32x128xbf16, #tpu.memory_space<vmem>>, vector<32x128xbf16>
    %cst_14 = arith.constant dense<0.000000e+00> : vector<256x128xf32>
    %18 = tpu.matmul %16, %17, %cst_14 {dimension_numbers = #tpu.dot_dimension_numbers<[1], [0], [0], [1], [0, 0, 1, 1], [], []>} : vector<256x32xbf16>, vector<32x128xbf16>, vector<256x128xf32> -> vector<256x128xf32>
    %c0_15 = arith.constant 0 : index
    %c0_16 = arith.constant 0 : index
    %19 = vector.load %arg7[%c0_15, %c0_16] : memref<1x128xf32, #tpu.memory_space<vmem>>, vector<1x128xf32>
    %20 = vector.broadcast %19 : vector<1x128xf32> to vector<256x128xf32>
    %21 = arith.addf %18, %20 : vector<256x128xf32>
    %22 = tpu.iota {dimensions = array<i32: 1>} : vector<256x128xi32>
    %c8_i32 = arith.constant 8 : i32
    %23 = vector.broadcast %c8_i32 : i32 to vector<256x128xi32>
    %24 = arith.cmpi slt, %22, %23 : vector<256x128xi32>
    %25 = math.tanh %21 : vector<256x128xf32>
    %26 = arith.select %24, %21, %25 : vector<256x128xi1>, vector<256x128xf32>
    %c0_17 = arith.constant 0 : index
    %c0_18 = arith.constant 0 : index
    %27 = vector.load %arg8[%c0_17, %c0_18] : memref<256x128xf32, #tpu.memory_space<vmem>>, vector<256x128xf32>
    tpu.vector_store %arg8[%c0_17, %c0_18], %26 {strides = array<i32>} : memref<256x128xf32, #tpu.memory_space<vmem>>, vector<256x128xf32>,
    return
  }
  func.func @transform_0(%arg0: i32) -> (i32, i32) {
    %c0_i32 = arith.constant 0 : i32
    %c0_i32_0 = arith.constant 0 : i32
    return %arg0, %c0_i32 : i32, i32
  }
  func.func @transform_1(%arg0: i32) -> (i32, i32) {
    %c0_i32 = arith.constant 0 : i32
    %c0_i32_0 = arith.constant 0 : i32
    %c0_i32_1 = arith.constant 0 : i32
    return %c0_i32, %c0_i32_0 : i32, i32
  }
  func.func @transform_2(%arg0: i32) -> (i32, i32) {
    %c0_i32 = arith.constant 0 : i32
    %c0_i32_0 = arith.constant 0 : i32
    %c0_i32_1 = arith.constant 0 : i32
    return %c0_i32, %c0_i32_0 : i32, i32
  }
  func.func @transform_3(%arg0: i32) -> (i32, i32) {
    %c0_i32 = arith.constant 0 : i32
    %c0_i32_0 = arith.constant 0 : i32
    %c0_i32_1 = arith.constant 0 : i32
    return %c0_i32, %c0_i32_0 : i32, i32
  }
  func.func @transform_4(%arg0: i32) -> (i32, i32) {
    %c0_i32 = arith.constant 0 : i32
    %c0_i32_0 = arith.constant 0 : i32
    %c0_i32_1 = arith.constant 0 : i32
    return %c0_i32, %c0_i32_0 : i32, i32
  }
  func.func @transform_5(%arg0: i32) -> (i32, i32) {
    %c0_i32 = arith.constant 0 : i32
    %c0_i32_0 = arith.constant 0 : i32
    %c0_i32_1 = arith.constant 0 : i32
    return %c0_i32, %c0_i32_0 : i32, i32
  }
  func.func @transform_6(%arg0: i32) -> (i32, i32) {
    %c0_i32 = arith.constant 0 : i32
    %c0_i32_0 = arith.constant 0 : i32
    %c0_i32_1 = arith.constant 0 : i32
    return %c0_i32, %c0_i32_0 : i32, i32
  }
  func.func @transform_7(%arg0: i32) -> (i32, i32) {
    %c0_i32 = arith.constant 0 : i32
    %c0_i32_0 = arith.constant 0 : i32
    return %arg0, %c0_i32 : i32, i32
  }
}

</mosaic_0001>

<bundles_post_ra>
// kernel: _policy_forward_impl.1
= control target key start
LH: loop header
LB: loop body
LE: loop exit
PB: predicated region body
PF: predicated region fallthrough
CT: control target
= control target key end

     0   :  { %vm162_vm0 = vcmask 261120   ;;  %s1794_s1 = inlined_call_operand.vmem [shape: bf16[32,32], index: 1, kind: input, shape index: {}]   ;;  %s1795_s0 = inlined_call_operand.vmem [shape: bf16[256,32], index: 0, kind: input, shape index: {}]   ;;  %s1796_s3 = inlined_call_operand.vmem [shape: bf16[32,32], index: 3, kind: input, shape index: {}]   ;;  %s1797_s5 = inlined_call_operand.vmem [shape: bf16[32,128], index: 5, kind: input, shape index: {}]   ;;  %s1798_s2 = inlined_call_operand.vmem [shape: f32[1,32], index: 2, kind: input, shape index: {}]   ;;  %s1799_s4 = inlined_call_operand.vmem [shape: f32[1,32], index: 4, kind: input, shape index: {}]   ;;  %s1800_s6 = inlined_call_operand.vmem [shape: f32[1,128], index: 6, kind: input, shape index: {}]   ;;  %s1801_s7 = inlined_call_operand.vmem [shape: f32[256,128], index: 7, kind: output, shape index: {}]  }
   0x1   :  { %v1274_v0 = vld [vmem:[%s1794_s1] sm:$0xff]   ;;  %v1275_v1 = vld [vmem:[%s1794_s1 + $0x8] sm:$0xff]   ;;  %v1278_v4 = vld [vmem:[%s1795_s0 + $0x10] sm:$0xff]  }
   0x2   :  { %1162 = vmatprep.subr.bf16.mxu0 %v1274_v0  ;;  %v1276_v2 = vld [vmem:[%s1795_s0] sm:$0xff]   ;;  %1270 = vmatprep.subr.bf16.mxu1 %v1274_v0  ;;  %v1277_v3 = vld [vmem:[%s1795_s0 + $0x8] sm:$0xff]   ;;  %v1286_v7 = vld [vmem:[%s1795_s0 + $0x50] sm:$0xff]  }
   0x3   :  { %1163 = vmatpush3.bf16.msra.mxu0 %v1274_v0  ;;  %1272 = vmatpush3.bf16.msra.mxu1 %v1274_v0  ;;  %v1284_v5 = vld [vmem:[%s1795_s0 + $0x40] sm:$0xff]   ;;  %v1285_v6 = vld [vmem:[%s1795_s0 + $0x48] sm:$0xff]   ;;  %v1279_v8 = vld [vmem:[%s1795_s0 + $0x18] sm:$0xff]  }
   0x4   :  { %1164 = vmatprep.subr.bf16.mxu0 %v1275_v1  ;;  %1166 = vmatprep.mubr.msk.bf16.mxu0 %vm162_vm0, %v1276_v2  ;;  %v1280_v9 = vld [vmem:[%s1795_s0 + $0x20] sm:$0xff]   ;;  %v1287_v10 = vld [vmem:[%s1795_s0 + $0x58] sm:$0xff]   ;;  %v1293_v13 = vld [vmem:[%s1796_s3 + $0x8] sm:$0xff]  }
   0x5   :  { %1271 = vmatprep.subr.bf16.mxu1 %v1275_v1  ;;  %1182 = vmatprep.mubr.msk.bf16.mxu1 %vm162_vm0, %v1284_v5  ;;  %v1288_v11 = vld [vmem:[%s1795_s0 + $0x60] sm:$0xff]   ;;  %v1281_v14 = vld [vmem:[%s1795_s0 + $0x28] sm:$0xff]   ;;  %v1282_v15 = vld [vmem:[%s1795_s0 + $0x30] sm:$0xff]  }
   0x6   :  { %v1292_v12 = vld [vmem:[%s1796_s3] sm:$0xff]   ;;  %v1289_v16 = vld [vmem:[%s1795_s0 + $0x68] sm:$0xff]   ;;  %v1290_v17 = vld [vmem:[%s1795_s0 + $0x70] sm:$0xff]  }
   0x7   :  { %1165 = vmatpush3.bf16.msra.mxu0 %v1275_v1  ;;  %1273 = vmatpush3.bf16.msra.mxu1 %v1275_v1  ;;  %v1283_v18 = vld [vmem:[%s1795_s0 + $0x38] sm:$0xff]   ;;  %v1294_v20 = vld [vmem:[%s1797_s5] sm:$0xff]   ;;  %v1295_v21 = vld [vmem:[%s1797_s5 + $0x8] sm:$0xff]  }
   0x8   :  { %1198 = vmatprep.subr.bf16.mxu1 %v1292_v12  ;;  %v1291_v19 = vld [vmem:[%s1795_s0 + $0x78] sm:$0xff]   ;;  %1234 = vmatprep.subr.bf16.mxu0 %v1294_v20  ;;  %v1485_v22 = vld [vmem:[%s1798_s2] ss:$0 sm:$0xff] }
   0xa   :  { %1167 = vmatmul.mubr.msk.bf16.vlgmr.msra.gmra.mrb[0].mxu0 %vm162_vm0, %v1277_v3  ;;  %1183 = vmatmul.mubr.msk.bf16.vlgmr.msra.gmra.mrb[0].mxu1 %vm162_vm0, %v1285_v6 }
   0xb   :  { %1170 = vmatprep.mubr.msk.bf16.mxu0 %vm162_vm0, %v1278_v4  ;;  %1186 = vmatprep.mubr.msk.bf16.mxu1 %vm162_vm0, %v1286_v7 }
   0xc   :  { %1199 = vmatpush3.bf16.msra.mxu1 %v1292_v12  ;;  %1235 = vmatpush3.bf16.msra.mxu0 %v1294_v20 }
   0xd   :  { %1200 = vmatprep.subr.bf16.mxu1 %v1293_v13  ;;  %1236 = vmatprep.subr.bf16.mxu0 %v1295_v21 }
  0x10   :  { %1201 = vmatpush3.bf16.msra.mxu1 %v1293_v13  ;;  %1237 = vmatpush3.bf16.msra.mxu0 %v1295_v21 }
  0x12   :  { %1171 = vmatmul.mubr.msk.bf16.gmra.mrb[4].mxu0 %vm162_vm0, %v1279_v8  ;;  %1187 = vmatmul.mubr.msk.bf16.gmra.mrb[4].mxu1 %vm162_vm0, %v1287_v10 }
  0x13   :  { %1174 = vmatprep.mubr.msk.bf16.mxu0 %vm162_vm0, %v1280_v9  ;;  %1190 = vmatprep.mubr.msk.bf16.mxu1 %vm162_vm0, %v1288_v11 }
  0x1a   :  { %1175 = vmatmul.mubr.msk.bf16.gmra.mrb[8].mxu0 %vm162_vm0, %v1281_v14  ;;  %1191 = vmatmul.mubr.msk.bf16.gmra.mrb[8].mxu1 %vm162_vm0, %v1289_v16 }
  0x1b   :  { %1178 = vmatprep.mubr.msk.bf16.mxu0 %vm162_vm0, %v1282_v15  ;;  %1194 = vmatprep.mubr.msk.bf16.mxu1 %vm162_vm0, %v1290_v17 }
  0x22   :  { %1179 = vmatmul.mubr.msk.bf16.gmra.mrb[12].mxu0 %vm162_vm0, %v1283_v18  ;;  %1195 = vmatmul.mubr.msk.bf16.gmra.mrb[12].mxu1 %vm162_vm0, %v1291_v19 }
  0xdd   :  { %v1168_v23 = vpop.f32.mrb[0].mxu0  ;;  %v1184_v30 = vpop.f32.mrb[0].mxu1 }
  0xde   :  { %v254_v24 = vadd.f32 %v1168_v23, %v1485_v22  ;;  %v245_v25 = vpop.f32.mrb[1].mxu0  ;;  %v318_v32 = vadd.f32 %v1184_v30, %v1485_v22  ;;  %v309_v33 = vpop.f32.mrb[1].mxu1 }
  0xdf   :  { %v246_v26 = vadd.f32 %v1485_v22, %v245_v25  ;;  %v1169_v27 = vpop.f32.mrb[2].mxu0  ;;  %v310_v36 = vadd.f32 %v1485_v22, %v309_v33  ;;  %v1185_v37 = vpop.f32.mrb[2].mxu1 }
  0xe0   :  { %v257_v28 = vadd.f32 %v1169_v27, %v1485_v22  ;;  %v248_v29 = vpop.f32.mrb[3].mxu0  ;;  %v374_v34 = vmax.f32 %v254_v24, 0.0  ;;  %v390_v40 = vmax.f32 %v318_v32, 0.0  ;;  %v321_v41 = vadd.f32 %v1185_v37, %v1485_v22  ;;  %v312_v42 = vpop.f32.mrb[3].mxu1 }
  0xe1   :  { %v249_v31 = vadd.f32 %v1485_v22, %v248_v29  ;;  %v372_v38 = vmax.f32 %v246_v26, 0.0  ;;  %v388_v44 = vmax.f32 %v310_v36, 0.0  ;;  %v313_v45 = vadd.f32 %v1485_v22, %v312_v42 }
  0xe2   :  { %v375_v35 = vmax.f32 %v257_v28, 0.0  ;;  %v391_v48 = vmax.f32 %v321_v41, 0.0 }
  0xe3   :  { %v373_v39 = vmax.f32 %v249_v31, 0.0  ;;  %v389_v51 = vmax.f32 %v313_v45, 0.0 }
  0xe4   :  { %v405_v43 = vpack.c.bf16 %v375_v35, %v374_v34  ;;  %v1498_v54 = vpack.c.bf16 %v391_v48, %v390_v40 }
  0xe5   :  { %v404_v46 = vpack.c.bf16 %v373_v39, %v372_v38  ;;  %v1172_v47 = vpop.f32.mrb[4].mxu0  ;;  %v1502_v57 = vpack.c.bf16 %v389_v51, %v388_v44  ;;  %v1188_v58 = vpop.f32.mrb[4].mxu1 }
  0xe6   :  { %v270_v49 = vadd.f32 %v1172_v47, %v1485_v22  ;;  %v261_v50 = vpop.f32.mrb[5].mxu0  ;;  %v334_v60 = vadd.f32 %v1188_v58, %v1485_v22  ;;  %v325_v61 = vpop.f32.mrb[5].mxu1 }
  0xe7   :  { %v262_v52 = vadd.f32 %v1485_v22, %v261_v50  ;;  %v1173_v53 = vpop.f32.mrb[6].mxu0  ;;  %1202 = vmatprep.mubr.msk.bf16.mxu1 %vm162_vm0, %v404_v46  ;;  %v326_v0 = vadd.f32 %v1485_v22, %v325_v61  ;;  %v1189_v1 = vpop.f32.mrb[6].mxu1 }
  0xe8   :  { %v273_v55 = vadd.f32 %v1173_v53, %v1485_v22  ;;  %v264_v56 = vpop.f32.mrb[7].mxu0  ;;  %1203 = vmatmul.mubr.msk.bf16.vlgmr.msra.gmra.mrb[16].mxu1 %vm162_vm0, %v405_v43  ;;  %v378_v62 = vmax.f32 %v270_v49, 0.0  ;;  %v394_v4 = vmax.f32 %v334_v60, 0.0  ;;  %v337_v5 = vadd.f32 %v1189_v1, %v1485_v22  ;;  %v328_v6 = vpop.f32.mrb[7].mxu1 }
  0xe9   :  { %v265_v59 = vadd.f32 %v1485_v22, %v264_v56  ;;  %v376_v2 = vmax.f32 %v262_v52, 0.0  ;;  %v392_v8 = vmax.f32 %v326_v0, 0.0  ;;  %v329_v9 = vadd.f32 %v1485_v22, %v328_v6 }
  0xea   :  { %v379_v63 = vmax.f32 %v273_v55, 0.0  ;;  %v395_v12 = vmax.f32 %v337_v5, 0.0 }
  0xeb   :  { %v377_v3 = vmax.f32 %v265_v59, 0.0  ;;  %v393_v15 = vmax.f32 %v329_v9, 0.0 }
  0xec   :  { %v407_v7 = vpack.c.bf16 %v379_v63, %v378_v62  ;;  %v415_v18 = vpack.c.bf16 %v395_v12, %v394_v4 }
  0xed   :  { %v406_v10 = vpack.c.bf16 %v377_v3, %v376_v2  ;;  %v1176_v11 = vpop.f32.mrb[8].mxu0  ;;  %v414_v21 = vpack.c.bf16 %v393_v15, %v392_v8  ;;  %v1192_v23 = vpop.f32.mrb[8].mxu1 }
  0xee   :  { %v286_v13 = vadd.f32 %v1176_v11, %v1485_v22  ;;  %v277_v14 = vpop.f32.mrb[9].mxu0  ;;  %v350_v25 = vadd.f32 %v1192_v23, %v1485_v22  ;;  %v341_v26 = vpop.f32.mrb[9].mxu1 }
  0xef   :  { %v278_v16 = vadd.f32 %v1485_v22, %v277_v14  ;;  %v1177_v17 = vpop.f32.mrb[10].mxu0  ;;  %1206 = vmatprep.mubr.msk.bf16.mxu1 %vm162_vm0, %v406_v10  ;;  %v342_v29 = vadd.f32 %v1485_v22, %v341_v26  ;;  %v1193_v30 = vpop.f32.mrb[10].mxu1 }
  0xf0   :  { %v289_v19 = vadd.f32 %v1177_v17, %v1485_v22  ;;  %v280_v20 = vpop.f32.mrb[11].mxu0  ;;  %1207 = vmatmul.mubr.msk.bf16.gmra.mrb[20].mxu1 %vm162_vm0, %v407_v7  ;;  %v382_v27 = vmax.f32 %v286_v13, 0.0  ;;  %v398_v33 = vmax.f32 %v350_v25, 0.0  ;;  %v353_v34 = vadd.f32 %v1193_v30, %v1485_v22  ;;  %v344_v35 = vpop.f32.mrb[11].mxu1 }
  0xf1   :  { %v281_v24 = vadd.f32 %v1485_v22, %v280_v20  ;;  %v380_v31 = vmax.f32 %v278_v16, 0.0  ;;  %v396_v37 = vmax.f32 %v342_v29, 0.0  ;;  %v345_v38 = vadd.f32 %v1485_v22, %v344_v35 }
  0xf2   :  { %v383_v28 = vmax.f32 %v289_v19, 0.0  ;;  %v399_v41 = vmax.f32 %v353_v34, 0.0 }
  0xf3   :  { %v381_v32 = vmax.f32 %v281_v24, 0.0  ;;  %v397_v44 = vmax.f32 %v345_v38, 0.0 }
  0xf4   :  { %v409_v36 = vpack.c.bf16 %v383_v28, %v382_v27  ;;  %v417_v47 = vpack.c.bf16 %v399_v41, %v398_v33 }
  0xf5   :  { %v408_v39 = vpack.c.bf16 %v381_v32, %v380_v31  ;;  %v1180_v40 = vpop.f32.mrb[12].mxu0  ;;  %v416_v50 = vpack.c.bf16 %v397_v44, %v396_v37  ;;  %v1196_v51 = vpop.f32.mrb[12].mxu1 }
  0xf6   :  { %v302_v42 = vadd.f32 %v1180_v40, %v1485_v22  ;;  %v293_v43 = vpop.f32.mrb[13].mxu0  ;;  %v366_v53 = vadd.f32 %v1196_v51, %v1485_v22  ;;  %v357_v55 = vpop.f32.mrb[13].mxu1 }
  0xf7   :  { %v294_v45 = vadd.f32 %v1485_v22, %v293_v43  ;;  %v1181_v46 = vpop.f32.mrb[14].mxu0  ;;  %1210 = vmatprep.mubr.msk.bf16.mxu1 %vm162_vm0, %v408_v39  ;;  %v358_v59 = vadd.f32 %v1485_v22, %v357_v55  ;;  %v1197_v60 = vpop.f32.mrb[14].mxu1 }
  0xf8   :  { %v305_v48 = vadd.f32 %v1181_v46, %v1485_v22  ;;  %v296_v49 = vpop.f32.mrb[15].mxu0  ;;  %1211 = vmatmul.mubr.msk.bf16.gmra.mrb[24].mxu1 %vm162_vm0, %v409_v36  ;;  %v386_v56 = vmax.f32 %v302_v42, 0.0  ;;  %v402_v63 = vmax.f32 %v366_v53, 0.0  ;;  %v369_v0 = vadd.f32 %v1197_v60, %v1485_v22  ;;  %v360_v1 = vpop.f32.mrb[15].mxu1 }
  0xf9   :  { %v297_v52 = vadd.f32 %v1485_v22, %v296_v49  ;;  %v384_v61 = vmax.f32 %v294_v45, 0.0  ;;  %v400_v3 = vmax.f32 %v358_v59, 0.0  ;;  %v361_v4 = vadd.f32 %v1485_v22, %v360_v1  ;;  %v1544_v22 = vld [vmem:[%s1799_s4] ss:$0 sm:$0xff] }
  0xfa   :  { %v387_v58 = vmax.f32 %v305_v48, 0.0  ;;  %v403_v6 = vmax.f32 %v369_v0, 0.0 }
  0xfb   :  { %v385_v62 = vmax.f32 %v297_v52, 0.0  ;;  %v401_v7 = vmax.f32 %v361_v4, 0.0 }
  0xfc   :  { %v411_v2 = vpack.c.bf16 %v387_v58, %v386_v56  ;;  %v419_v8 = vpack.c.bf16 %v403_v6, %v402_v63 }
  0xfd   :  { %v410_v5 = vpack.c.bf16 %v385_v62, %v384_v61  ;;  %v418_v9 = vpack.c.bf16 %v401_v7, %v400_v3 }
  0xff   :  { %1214 = vmatprep.mubr.msk.bf16.mxu1 %vm162_vm0, %v410_v5 }
 0x100   :  { %1215 = vmatmul.mubr.msk.bf16.gmra.mrb[28].mxu1 %vm162_vm0, %v411_v2 }
 0x101   :  { %1218 = vmatprep.mubr.msk.bf16.mxu1 %vm162_vm0, %v1502_v57 }
 0x108   :  { %1219 = vmatmul.mubr.msk.bf16.gmra.mrb[32].mxu1 %vm162_vm0, %v1498_v54 }
 0x109   :  { %1222 = vmatprep.mubr.msk.bf16.mxu1 %vm162_vm0, %v414_v21 }
 0x110   :  { %1223 = vmatmul.mubr.msk.bf16.gmra.mrb[36].mxu1 %vm162_vm0, %v415_v18 }
 0x111   :  { %1226 = vmatprep.mubr.msk.bf16.mxu1 %vm162_vm0, %v416_v50 }
 0x118   :  { %1227 = vmatmul.mubr.msk.bf16.gmra.mrb[40].mxu1 %vm162_vm0, %v417_v47 }
 0x119   :  { %1230 = vmatprep.mubr.msk.bf16.mxu1 %vm162_vm0, %v418_v9 }
 0x120   :  { %1231 = vmatmul.mubr.msk.bf16.gmra.mrb[44].mxu1 %vm162_vm0, %v419_v8 }
 0x1bb   :  { %v1204_v57 = vpop.f32.mrb[16].mxu1 }
 0x1bc   :  { %v534_v54 = vadd.f32 %v1204_v57, %v1544_v22  ;;  %v525_v10 = vpop.f32.mrb[17].mxu1 }
 0x1bd   :  { %v526_v11 = vadd.f32 %v1544_v22, %v525_v10  ;;  %v1205_v12 = vpop.f32.mrb[18].mxu1 }
 0x1be   :  { %v537_v13 = vadd.f32 %v1205_v12, %v1544_v22  ;;  %v528_v14 = vpop.f32.mrb[19].mxu1  ;;  %v654_v16 = vmax.f32 %v534_v54, 0.0 }
 0x1bf   :  { %v529_v15 = vadd.f32 %v1544_v22, %v528_v14  ;;  %v652_v18 = vmax.f32 %v526_v11, 0.0 }
 0x1c0   :  { %v655_v17 = vmax.f32 %v537_v13, 0.0 }
 0x1c1   :  { %v653_v19 = vmax.f32 %v529_v15, 0.0 }
 0x1c2   :  { %v685_v20 = vpack.c.bf16 %v655_v17, %v654_v16 }
 0x1c3   :  { %v684_v21 = vpack.c.bf16 %v653_v19, %v652_v18  ;;  %v1208_v23 = vpop.f32.mrb[20].mxu1 }
 0x1c4   :  { %v550_v24 = vadd.f32 %v1208_v23, %v1544_v22  ;;  %v541_v25 = vpop.f32.mrb[21].mxu1 }
 0x1c5   :  { %v542_v26 = vadd.f32 %v1544_v22, %v541_v25  ;;  %v1209_v27 = vpop.f32.mrb[22].mxu1  ;;  %1238 = vmatprep.mubr.msk.bf16.mxu0 %vm162_vm0, %v684_v21 }
 0x1c6   :  { %v553_v28 = vadd.f32 %v1209_v27, %v1544_v22  ;;  %v544_v29 = vpop.f32.mrb[23].mxu1  ;;  %1239 = vmatmul.mubr.msk.bf16.vlgmr.msra.gmra.mrb[16].mxu0 %vm162_vm0, %v685_v20  ;;  %v658_v31 = vmax.f32 %v550_v24, 0.0 }
 0x1c7   :  { %v545_v30 = vadd.f32 %v1544_v22, %v544_v29  ;;  %v656_v33 = vmax.f32 %v542_v26, 0.0 }
 0x1c8   :  { %v659_v32 = vmax.f32 %v553_v28, 0.0 }
 0x1c9   :  { %v657_v34 = vmax.f32 %v545_v30, 0.0 }
 0x1ca   :  { %v687_v35 = vpack.c.bf16 %v659_v32, %v658_v31 }
 0x1cb   :  { %v686_v36 = vpack.c.bf16 %v657_v34, %v656_v33  ;;  %v1212_v37 = vpop.f32.mrb[24].mxu1 }
 0x1cc   :  { %v566_v38 = vadd.f32 %v1212_v37, %v1544_v22  ;;  %v557_v39 = vpop.f32.mrb[25].mxu1 }
 0x1cd   :  { %v558_v40 = vadd.f32 %v1544_v22, %v557_v39  ;;  %v1213_v41 = vpop.f32.mrb[26].mxu1  ;;  %1242 = vmatprep.mubr.msk.bf16.mxu0 %vm162_vm0, %v686_v36 }
 0x1ce   :  { %v569_v42 = vadd.f32 %v1213_v41, %v1544_v22  ;;  %v560_v43 = vpop.f32.mrb[27].mxu1  ;;  %1243 = vmatmul.mubr.msk.bf16.gmra.mrb[20].mxu0 %vm162_vm0, %v687_v35  ;;  %v662_v45 = vmax.f32 %v566_v38, 0.0 }
 0x1cf   :  { %v561_v44 = vadd.f32 %v1544_v22, %v560_v43  ;;  %v660_v47 = vmax.f32 %v558_v40, 0.0 }
 0x1d0   :  { %v663_v46 = vmax.f32 %v569_v42, 0.0 }
 0x1d1   :  { %v661_v48 = vmax.f32 %v561_v44, 0.0 }
 0x1d2   :  { %v689_v49 = vpack.c.bf16 %v663_v46, %v662_v45 }
 0x1d3   :  { %v688_v50 = vpack.c.bf16 %v661_v48, %v660_v47  ;;  %v1216_v51 = vpop.f32.mrb[28].mxu1 }
 0x1d4   :  { %v582_v52 = vadd.f32 %v1216_v51, %v1544_v22  ;;  %v573_v53 = vpop.f32.mrb[29].mxu1 }
 0x1d5   :  { %v574_v55 = vadd.f32 %v1544_v22, %v573_v53  ;;  %v1217_v56 = vpop.f32.mrb[30].mxu1  ;;  %1246 = vmatprep.mubr.msk.bf16.mxu0 %vm162_vm0, %v688_v50 }
 0x1d6   :  { %v585_v58 = vadd.f32 %v1217_v56, %v1544_v22  ;;  %v576_v59 = vpop.f32.mrb[31].mxu1  ;;  %1247 = vmatmul.mubr.msk.bf16.gmra.mrb[24].mxu0 %vm162_vm0, %v689_v49  ;;  %v666_v61 = vmax.f32 %v582_v52, 0.0 }
 0x1d7   :  { %v577_v60 = vadd.f32 %v1544_v22, %v576_v59  ;;  %v664_v63 = vmax.f32 %v574_v55, 0.0 }
 0x1d8   :  { %v667_v62 = vmax.f32 %v585_v58, 0.0 }
 0x1d9   :  { %v665_v0 = vmax.f32 %v577_v60, 0.0  ;;  %v1597_v60 = vld [vmem:[%s1800_s6] ss:$0 sm:$0xff] }
 0x1da   :  { %v691_v1 = vpack.c.bf16 %v667_v62, %v666_v61 }
 0x1db   :  { %v690_v2 = vpack.c.bf16 %v665_v0, %v664_v63  ;;  %v1220_v3 = vpop.f32.mrb[32].mxu1 }
 0x1dc   :  { %v598_v4 = vadd.f32 %v1220_v3, %v1544_v22  ;;  %v589_v5 = vpop.f32.mrb[33].mxu1 }
 0x1dd   :  { %v590_v6 = vadd.f32 %v1544_v22, %v589_v5  ;;  %v1221_v7 = vpop.f32.mrb[34].mxu1  ;;  %1250 = vmatprep.mubr.msk.bf16.mxu0 %vm162_vm0, %v690_v2 }
 0x1de   :  { %v601_v8 = vadd.f32 %v1221_v7, %v1544_v22  ;;  %v592_v9 = vpop.f32.mrb[35].mxu1  ;;  %1251 = vmatmul.mubr.msk.bf16.gmra.mrb[28].mxu0 %vm162_vm0, %v691_v1  ;;  %v670_v54 = vmax.f32 %v598_v4, 0.0  ;;  %v932_v1 = vlaneseq }
 0x1df   :  { %v593_v57 = vadd.f32 %v1544_v22, %v592_v9  ;;  %v668_v11 = vmax.f32 %v590_v6, 0.0 }
 0x1e0   :  { %v671_v10 = vmax.f32 %v601_v8, 0.0  ;;  %v1603_v5 = vand.u32 127, %v932_v1 }
 0x1e1   :  { %v669_v12 = vmax.f32 %v593_v57, 0.0 }
 0x1e2   :  { %v693_v13 = vpack.c.bf16 %v671_v10, %v670_v54  ;;  %vm934_vm1 = vcmp.lt.s32.totalorder %v1603_v5, 8 }
 0x1e3   :  { %v692_v14 = vpack.c.bf16 %v669_v12, %v668_v11  ;;  %v1224_v15 = vpop.f32.mrb[36].mxu1 }
 0x1e4   :  { %v614_v16 = vadd.f32 %v1224_v15, %v1544_v22  ;;  %v605_v17 = vpop.f32.mrb[37].mxu1 }
 0x1e5   :  { %v606_v18 = vadd.f32 %v1544_v22, %v605_v17  ;;  %v1225_v19 = vpop.f32.mrb[38].mxu1  ;;  %1254 = vmatprep.mubr.msk.bf16.mxu0 %vm162_vm0, %v692_v14 }
 0x1e6   :  { %v617_v20 = vadd.f32 %v1225_v19, %v1544_v22  ;;  %v608_v21 = vpop.f32.mrb[39].mxu1  ;;  %1255 = vmatmul.mubr.msk.bf16.gmra.mrb[32].mxu0 %vm162_vm0, %v693_v13  ;;  %v674_v24 = vmax.f32 %v614_v16, 0.0 }
 0x1e7   :  { %v609_v23 = vadd.f32 %v1544_v22, %v608_v21  ;;  %v672_v26 = vmax.f32 %v606_v18, 0.0 }
 0x1e8   :  { %v675_v25 = vmax.f32 %v617_v20, 0.0 }
 0x1e9   :  { %v673_v27 = vmax.f32 %v609_v23, 0.0 }
 0x1ea   :  { %v695_v28 = vpack.c.bf16 %v675_v25, %v674_v24 }
 0x1eb   :  { %v694_v29 = vpack.c.bf16 %v673_v27, %v672_v26  ;;  %v1228_v30 = vpop.f32.mrb[40].mxu1 }
 0x1ec   :  { %v630_v31 = vadd.f32 %v1228_v30, %v1544_v22  ;;  %v621_v32 = vpop.f32.mrb[41].mxu1 }
 0x1ed   :  { %v622_v33 = vadd.f32 %v1544_v22, %v621_v32  ;;  %v1229_v34 = vpop.f32.mrb[42].mxu1  ;;  %1258 = vmatprep.mubr.msk.bf16.mxu0 %vm162_vm0, %v694_v29 }
 0x1ee   :  { %v633_v35 = vadd.f32 %v1229_v34, %v1544_v22  ;;  %v624_v36 = vpop.f32.mrb[43].mxu1  ;;  %1259 = vmatmul.mubr.msk.bf16.gmra.mrb[36].mxu0 %vm162_vm0, %v695_v28  ;;  %v678_v38 = vmax.f32 %v630_v31, 0.0 }
 0x1ef   :  { %v625_v37 = vadd.f32 %v1544_v22, %v624_v36  ;;  %v676_v40 = vmax.f32 %v622_v33, 0.0 }
 0x1f0   :  { %v679_v39 = vmax.f32 %v633_v35, 0.0 }
 0x1f1   :  { %v677_v41 = vmax.f32 %v625_v37, 0.0 }
 0x1f2   :  { %v697_v42 = vpack.c.bf16 %v679_v39, %v678_v38 }
 0x1f3   :  { %v696_v43 = vpack.c.bf16 %v677_v41, %v676_v40  ;;  %v1232_v44 = vpop.f32.mrb[44].mxu1 }
 0x1f4   :  { %v646_v45 = vadd.f32 %v1232_v44, %v1544_v22  ;;  %v637_v46 = vpop.f32.mrb[45].mxu1 }
 0x1f5   :  { %v638_v47 = vadd.f32 %v1544_v22, %v637_v46  ;;  %v1233_v48 = vpop.f32.mrb[46].mxu1  ;;  %1262 = vmatprep.mubr.msk.bf16.mxu0 %vm162_vm0, %v696_v43 }
 0x1f6   :  { %v649_v49 = vadd.f32 %v1233_v48, %v1544_v22  ;;  %v640_v50 = vpop.f32.mrb[47].mxu1  ;;  %1263 = vmatmul.mubr.msk.bf16.gmra.mrb[40].mxu0 %vm162_vm0, %v697_v42  ;;  %v682_v52 = vmax.f32 %v646_v45, 0.0 }
 0x1f7   :  { %v641_v51 = vadd.f32 %v1544_v22, %v640_v50  ;;  %v680_v55 = vmax.f32 %v638_v47, 0.0 }
 0x1f8   :  { %v683_v53 = vmax.f32 %v649_v49, 0.0 }
 0x1f9   :  { %v681_v56 = vmax.f32 %v641_v51, 0.0 }
 0x1fa   :  { %v699_v58 = vpack.c.bf16 %v683_v53, %v682_v52 }
 0x1fb   :  { %v698_v59 = vpack.c.bf16 %v681_v56, %v680_v55 }
 0x1fd   :  { %1266 = vmatprep.mubr.msk.bf16.mxu0 %vm162_vm0, %v698_v59 }
 0x1fe   :  { %1267 = vmatmul.mubr.msk.bf16.gmra.mrb[44].mxu0 %vm162_vm0, %v699_v58 }
 0x299   :  { %v1240_v61 = vpop.f32.mrb[16].mxu0 }
 0x29a   :  { %v814_v62 = vadd.f32 %v1240_v61, %v1597_v60  ;;  %v805_v63 = vpop.f32.mrb[17].mxu0 }
 0x29b   :  { %v806_v22 = vadd.f32 %v1597_v60, %v805_v63  ;;  %v1241_v0 = vpop.f32.mrb[18].mxu0 }
 0x29c   :  { %1296 = vtanh.f32 %v814_v62  ;;  %v817_v2 = vadd.f32 %v1241_v0, %v1597_v60  ;;  %v808_v3 = vpop.f32.mrb[19].mxu0 }
 0x29d   :  { %1298 = vtanh.f32 %v806_v22  ;;  %v809_v4 = vadd.f32 %v1597_v60, %v808_v3 }
 0x29e   :  { %1300 = vtanh.f32 %v817_v2 }
 0x29f   :  { %1302 = vtanh.f32 %v809_v4 }
 0x2a1   :  { %v1244_v6 = vpop.f32.mrb[20].mxu0 }
 0x2a2   :  { %v830_v7 = vadd.f32 %v1244_v6, %v1597_v60  ;;  %v821_v8 = vpop.f32.mrb[21].mxu0 }
 0x2a3   :  { %v822_v9 = vadd.f32 %v1597_v60, %v821_v8  ;;  %v1245_v57 = vpop.f32.mrb[22].mxu0 }
 0x2a4   :  { %1304 = vtanh.f32 %v830_v7  ;;  %v833_v54 = vadd.f32 %v1245_v57, %v1597_v60  ;;  %v824_v10 = vpop.f32.mrb[23].mxu0 }
 0x2a5   :  { %1306 = vtanh.f32 %v822_v9  ;;  %v825_v11 = vadd.f32 %v1597_v60, %v824_v10 }
 0x2a6   :  { %v1297_v12 = vpop.eup %1296  ;;  %1308 = vtanh.f32 %v833_v54 }
 0x2a7   :  { %v1299_v13 = vpop.eup %1298  ;;  %v969_v14 = vsel %vm934_vm1, %v814_v62, %v1297_v12  ;;  %1310 = vtanh.f32 %v825_v11 }
 0x2a8   :  { %v1301_v15 = vpop.eup %1300  ;;  %1001 = vst [vmem:[%s1801_s7 + $0x10] sm:$0xff] %v969_v14  ;;  %v967_v16 = vsel %vm934_vm1, %v806_v22, %v1299_v13 }
 0x2a9   :  { %v1303_v17 = vpop.eup %1302  ;;  %999 = vst [vmem:[%s1801_s7] sm:$0xff] %v967_v16  ;;  %v970_v18 = vsel %vm934_vm1, %v817_v2, %v1301_v15  ;;  %v1248_v19 = vpop.f32.mrb[24].mxu0 }
 0x2aa   :  { %1002 = vst [vmem:[%s1801_s7 + $0x18] sm:$0xff] %v970_v18  ;;  %v968_v20 = vsel %vm934_vm1, %v809_v4, %v1303_v17  ;;  %v846_v21 = vadd.f32 %v1248_v19, %v1597_v60  ;;  %v837_v23 = vpop.f32.mrb[25].mxu0 }
 0x2ab   :  { %1000 = vst [vmem:[%s1801_s7 + $0x8] sm:$0xff] %v968_v20  ;;  %v838_v24 = vadd.f32 %v1597_v60, %v837_v23  ;;  %v1249_v25 = vpop.f32.mrb[26].mxu0 }
 0x2ac   :  { %1312 = vtanh.f32 %v846_v21  ;;  %v849_v26 = vadd.f32 %v1249_v25, %v1597_v60  ;;  %v840_v27 = vpop.f32.mrb[27].mxu0 }
 0x2ad   :  { %1314 = vtanh.f32 %v838_v24  ;;  %v841_v28 = vadd.f32 %v1597_v60, %v840_v27 }
 0x2ae   :  { %v1305_v29 = vpop.eup %1304  ;;  %1316 = vtanh.f32 %v849_v26 }
 0x2af   :  { %v1307_v30 = vpop.eup %1306  ;;  %v973_v31 = vsel %vm934_vm1, %v830_v7, %v1305_v29  ;;  %1318 = vtanh.f32 %v841_v28 }
 0x2b0   :  { %v1309_v32 = vpop.eup %1308  ;;  %1005 = vst [vmem:[%s1801_s7 + $0x30] sm:$0xff] %v973_v31  ;;  %v971_v33 = vsel %vm934_vm1, %v822_v9, %v1307_v30 }
 0x2b1   :  { %v1311_v34 = vpop.eup %1310  ;;  %1003 = vst [vmem:[%s1801_s7 + $0x20] sm:$0xff] %v971_v33  ;;  %v974_v35 = vsel %vm934_vm1, %v833_v54, %v1309_v32  ;;  %v1252_v36 = vpop.f32.mrb[28].mxu0 }
 0x2b2   :  { %1006 = vst [vmem:[%s1801_s7 + $0x38] sm:$0xff] %v974_v35  ;;  %v972_v37 = vsel %vm934_vm1, %v825_v11, %v1311_v34  ;;  %v862_v38 = vadd.f32 %v1252_v36, %v1597_v60  ;;  %v853_v39 = vpop.f32.mrb[29].mxu0 }
 0x2b3   :  { %1004 = vst [vmem:[%s1801_s7 + $0x28] sm:$0xff] %v972_v37  ;;  %v854_v40 = vadd.f32 %v1597_v60, %v853_v39  ;;  %v1253_v41 = vpop.f32.mrb[30].mxu0 }
 0x2b4   :  { %1320 = vtanh.f32 %v862_v38  ;;  %v865_v42 = vadd.f32 %v1253_v41, %v1597_v60  ;;  %v856_v43 = vpop.f32.mrb[31].mxu0 }
 0x2b5   :  { %1322 = vtanh.f32 %v854_v40  ;;  %v857_v44 = vadd.f32 %v1597_v60, %v856_v43 }
 0x2b6   :  { %v1313_v45 = vpop.eup %1312  ;;  %1324 = vtanh.f32 %v865_v42 }
 0x2b7   :  { %v1315_v46 = vpop.eup %1314  ;;  %v977_v47 = vsel %vm934_vm1, %v846_v21, %v1313_v45  ;;  %1326 = vtanh.f32 %v857_v44 }
 0x2b8   :  { %v1317_v48 = vpop.eup %1316  ;;  %1009 = vst [vmem:[%s1801_s7 + $0x50] sm:$0xff] %v977_v47  ;;  %v975_v49 = vsel %vm934_vm1, %v838_v24, %v1315_v46 }
 0x2b9   :  { %v1319_v50 = vpop.eup %1318  ;;  %1007 = vst [vmem:[%s1801_s7 + $0x40] sm:$0xff] %v975_v49  ;;  %v978_v51 = vsel %vm934_vm1, %v849_v26, %v1317_v48  ;;  %v1256_v52 = vpop.f32.mrb[32].mxu0 }
 0x2ba   :  { %1010 = vst [vmem:[%s1801_s7 + $0x58] sm:$0xff] %v978_v51  ;;  %v976_v53 = vsel %vm934_vm1, %v841_v28, %v1319_v50  ;;  %v878_v55 = vadd.f32 %v1256_v52, %v1597_v60  ;;  %v869_v56 = vpop.f32.mrb[33].mxu0 }
 0x2bb   :  { %1008 = vst [vmem:[%s1801_s7 + $0x48] sm:$0xff] %v976_v53  ;;  %v870_v58 = vadd.f32 %v1597_v60, %v869_v56  ;;  %v1257_v59 = vpop.f32.mrb[34].mxu0 }
 0x2bc   :  { %1328 = vtanh.f32 %v878_v55  ;;  %v881_v61 = vadd.f32 %v1257_v59, %v1597_v60  ;;  %v872_v62 = vpop.f32.mrb[35].mxu0 }
 0x2bd   :  { %1330 = vtanh.f32 %v870_v58  ;;  %v873_v63 = vadd.f32 %v1597_v60, %v872_v62 }
 0x2be   :  { %v1321_v22 = vpop.eup %1320  ;;  %1332 = vtanh.f32 %v881_v61 }
 0x2bf   :  { %v1323_v0 = vpop.eup %1322  ;;  %v981_v1 = vsel %vm934_vm1, %v862_v38, %v1321_v22  ;;  %1334 = vtanh.f32 %v873_v63 }
 0x2c0   :  { %v1325_v2 = vpop.eup %1324  ;;  %1013 = vst [vmem:[%s1801_s7 + $0x70] sm:$0xff] %v981_v1  ;;  %v979_v3 = vsel %vm934_vm1, %v854_v40, %v1323_v0 }
 0x2c1   :  { %v1327_v4 = vpop.eup %1326  ;;  %1011 = vst [vmem:[%s1801_s7 + $0x60] sm:$0xff] %v979_v3  ;;  %v982_v6 = vsel %vm934_vm1, %v865_v42, %v1325_v2  ;;  %v1260_v7 = vpop.f32.mrb[36].mxu0 }
 0x2c2   :  { %1014 = vst [vmem:[%s1801_s7 + $0x78] sm:$0xff] %v982_v6  ;;  %v980_v8 = vsel %vm934_vm1, %v857_v44, %v1327_v4  ;;  %v894_v9 = vadd.f32 %v1260_v7, %v1597_v60  ;;  %v885_v57 = vpop.f32.mrb[37].mxu0 }
 0x2c3   :  { %1012 = vst [vmem:[%s1801_s7 + $0x68] sm:$0xff] %v980_v8  ;;  %v886_v54 = vadd.f32 %v1597_v60, %v885_v57  ;;  %v1261_v10 = vpop.f32.mrb[38].mxu0 }
 0x2c4   :  { %1336 = vtanh.f32 %v894_v9  ;;  %v897_v11 = vadd.f32 %v1261_v10, %v1597_v60  ;;  %v888_v12 = vpop.f32.mrb[39].mxu0 }
 0x2c5   :  { %1338 = vtanh.f32 %v886_v54  ;;  %v889_v13 = vadd.f32 %v1597_v60, %v888_v12 }
 0x2c6   :  { %v1329_v14 = vpop.eup %1328  ;;  %1340 = vtanh.f32 %v897_v11 }
 0x2c7   :  { %v1331_v15 = vpop.eup %1330  ;;  %v985_v16 = vsel %vm934_vm1, %v878_v55, %v1329_v14  ;;  %1342 = vtanh.f32 %v889_v13 }
 0x2c8   :  { %v1333_v17 = vpop.eup %1332  ;;  %1017 = vst [vmem:[%s1801_s7 + $0x90] sm:$0xff] %v985_v16  ;;  %v983_v18 = vsel %vm934_vm1, %v870_v58, %v1331_v15 }
 0x2c9   :  { %v1335_v19 = vpop.eup %1334  ;;  %1015 = vst [vmem:[%s1801_s7 + $0x80] sm:$0xff] %v983_v18  ;;  %v986_v20 = vsel %vm934_vm1, %v881_v61, %v1333_v17  ;;  %v1264_v21 = vpop.f32.mrb[40].mxu0 }
 0x2ca   :  { %1018 = vst [vmem:[%s1801_s7 + $0x98] sm:$0xff] %v986_v20  ;;  %v984_v23 = vsel %vm934_vm1, %v873_v63, %v1335_v19  ;;  %v910_v24 = vadd.f32 %v1264_v21, %v1597_v60  ;;  %v901_v25 = vpop.f32.mrb[41].mxu0 }
 0x2cb   :  { %1016 = vst [vmem:[%s1801_s7 + $0x88] sm:$0xff] %v984_v23  ;;  %v902_v26 = vadd.f32 %v1597_v60, %v901_v25  ;;  %v1265_v27 = vpop.f32.mrb[42].mxu0 }
 0x2cc   :  { %1344 = vtanh.f32 %v910_v24  ;;  %v913_v28 = vadd.f32 %v1265_v27, %v1597_v60  ;;  %v904_v29 = vpop.f32.mrb[43].mxu0 }
 0x2cd   :  { %1346 = vtanh.f32 %v902_v26  ;;  %v905_v30 = vadd.f32 %v1597_v60, %v904_v29 }
 0x2ce   :  { %v1337_v31 = vpop.eup %1336  ;;  %1348 = vtanh.f32 %v913_v28 }
 0x2cf   :  { %v1339_v32 = vpop.eup %1338  ;;  %v989_v33 = vsel %vm934_vm1, %v894_v9, %v1337_v31  ;;  %1350 = vtanh.f32 %v905_v30 }
 0x2d0   :  { %v1341_v34 = vpop.eup %1340  ;;  %1021 = vst [vmem:[%s1801_s7 + $0xb0] sm:$0xff] %v989_v33  ;;  %v987_v35 = vsel %vm934_vm1, %v886_v54, %v1339_v32 }
 0x2d1   :  { %v1343_v36 = vpop.eup %1342  ;;  %1019 = vst [vmem:[%s1801_s7 + $0xa0] sm:$0xff] %v987_v35  ;;  %v990_v37 = vsel %vm934_vm1, %v897_v11, %v1341_v34  ;;  %v1268_v38 = vpop.f32.mrb[44].mxu0 }
 0x2d2   :  { %1022 = vst [vmem:[%s1801_s7 + $0xb8] sm:$0xff] %v990_v37  ;;  %v988_v39 = vsel %vm934_vm1, %v889_v13, %v1343_v36  ;;  %v926_v40 = vadd.f32 %v1268_v38, %v1597_v60  ;;  %v917_v41 = vpop.f32.mrb[45].mxu0 }
 0x2d3   :  { %1020 = vst [vmem:[%s1801_s7 + $0xa8] sm:$0xff] %v988_v39  ;;  %v918_v42 = vadd.f32 %v1597_v60, %v917_v41  ;;  %v1269_v43 = vpop.f32.mrb[46].mxu0 }
 0x2d4   :  { %1352 = vtanh.f32 %v926_v40  ;;  %v929_v44 = vadd.f32 %v1269_v43, %v1597_v60  ;;  %v920_v45 = vpop.f32.mrb[47].mxu0 }
 0x2d5   :  { %1354 = vtanh.f32 %v918_v42  ;;  %v921_v46 = vadd.f32 %v1597_v60, %v920_v45 }
 0x2d6   :  { %v1345_v47 = vpop.eup %1344  ;;  %1356 = vtanh.f32 %v929_v44 }
 0x2d7   :  { %v1347_v48 = vpop.eup %1346  ;;  %v993_v49 = vsel %vm934_vm1, %v910_v24, %v1345_v47  ;;  %1358 = vtanh.f32 %v921_v46 }
 0x2d8   :  { %v1349_v50 = vpop.eup %1348  ;;  %1025 = vst [vmem:[%s1801_s7 + $0xd0] sm:$0xff] %v993_v49  ;;  %v991_v51 = vsel %vm934_vm1, %v902_v26, %v1347_v48 }
 0x2d9   :  { %v1351_v52 = vpop.eup %1350  ;;  %1023 = vst [vmem:[%s1801_s7 + $0xc0] sm:$0xff] %v991_v51  ;;  %v994_v60 = vsel %vm934_vm1, %v913_v28, %v1349_v50 }
 0x2da   :  { %1026 = vst [vmem:[%s1801_s7 + $0xd8] sm:$0xff] %v994_v60  ;;  %v992_v53 = vsel %vm934_vm1, %v905_v30, %v1351_v52 }
 0x2db   :  { %1024 = vst [vmem:[%s1801_s7 + $0xc8] sm:$0xff] %v992_v53 }
 0x2de   :  { %v1353_v55 = vpop.eup %1352 }
 0x2df   :  { %v1355_v56 = vpop.eup %1354  ;;  %v997_v58 = vsel %vm934_vm1, %v926_v40, %v1353_v55 }
 0x2e0   :  { %v1357_v59 = vpop.eup %1356  ;;  %1029 = vst [vmem:[%s1801_s7 + $0xf0] sm:$0xff] %v997_v58  ;;  %v995_v61 = vsel %vm934_vm1, %v918_v42, %v1355_v56 }
 0x2e1   :  { %v1359_v62 = vpop.eup %1358  ;;  %1027 = vst [vmem:[%s1801_s7 + $0xe0] sm:$0xff] %v995_v61  ;;  %v998_v63 = vsel %vm934_vm1, %v929_v44, %v1357_v59 }
 0x2e2   :  { %1030 = vst [vmem:[%s1801_s7 + $0xf8] sm:$0xff] %v998_v63  ;;  %v996_v22 = vsel %vm934_vm1, %v921_v46, %v1359_v62 }
 0x2e3   :  { %1028 = vst [vmem:[%s1801_s7 + $0xe8] sm:$0xff] %v996_v22 }

</bundles_post_ra>
